<compile_context>
chip_gen: v7x
topology: tpu7x:2x2x1
jax: 0.10.0
libtpu: 0.0.40
codegen_flags: <defaults>
</compile_context>

<pallas_src>
import functools

import jax
import jax.numpy as jnp
from jax.experimental import pallas as pl
from jax.experimental.pallas import tpu as pltpu

_BIG = 1e30  # padding sentinel; assumes |logits|, |labels|, |margin| << 1e30
             # and finite inputs (inf/NaN would break the padding trick).


def _round_up(x, m):
    return ((x + m - 1) // m) * m


def _ranking_loss_kernel(lg_col_ref, lb_col_ref, lg_row_ref, lb_row_ref,
                         partial_ref, acc_ref, *, margin, block_i, block_j):
    j = pl.program_id(1)
    nj = pl.num_programs(1)

    lg_c = lg_col_ref[...]          # (block_i, 1)  f32
    lb_c = lb_col_ref[...]          # (block_i, 1)  f32
    lg_r = lg_row_ref[...]          # (1, block_j)  f32
    lb_r = lb_row_ref[...]          # (1, block_j)  f32

    m = jnp.float32(margin)
    hi = lb_r + m                   # (1, block_j): row-wise precompute, O(block_j)
    lo = lb_r - m                   # (1, block_j)

    # Column broadcasts bound once, reused in every 128-lane chunk.
    lg_c_b = jnp.broadcast_to(lg_c, (block_i, 128))
    lb_c_b = jnp.broadcast_to(lb_c, (block_i, 128))

    zero = jnp.float32(0.0)

    # Compute residuals one 128-lane column chunk at a time and fold the
    # chunks together with VALU adds.  Static 128-aligned lane slices only;
    # nothing (block_i, block_j)-sized is ever materialized.
    chunk = None
    for k in range(block_j // 128):
        sl = slice(k * 128, (k + 1) * 128)
        r_k = jnp.maximum(
            jnp.where(lg_c_b >= lg_r[:, sl],
                      hi[:, sl] - lb_c_b,
                      lb_c_b - lo[:, sl]),
            zero)
        chunk = r_k if chunk is None else chunk + r_k

    # Persistent accumulator is only (block_i, 128): tiny load/store traffic.
    @pl.when(j == 0)
    def _():
        acc_ref[...] = chunk

    @pl.when(j > 0)
    def _():
        acc_ref[...] = acc_ref[...] + chunk

    # End of row strip: fold sublanes down to one lane-dense (8, 128) per-lane
    # partial with a short VALU add chain (no XLU reduce, no scalar fill).
    @pl.when(j == nj - 1)
    def _():
        acc = acc_ref[...]                      # (block_i, 128)
        part = acc[0:8, :]
        for s in range(1, block_i // 8):
            part = part + acc[s * 8:(s + 1) * 8, :]
        partial_ref[...] = part


def ranking_loss(logits, labels, margin=0.0, *, block_i=None, block_j=None):
    """Pallas TPU implementation of get_ranking_loss for 1-D logits/labels."""
    assert logits.ndim == 1 and logits.shape == labels.shape
    n = int(logits.shape[0])
    logits = logits.astype(jnp.float32)
    labels = labels.astype(jnp.float32)

    # Tile sizes: lane tile a multiple of 128, sublane tile a multiple of 8.
    # Larger defaults than v1: per-tile compute now clearly exceeds the
    # ~0.35us per-grid-step overhead, and VMEM footprint stays tiny since the
    # accumulator is only 128 lanes wide.
    if block_j is None:
        block_j = min(2048, _round_up(n, 128))
    if block_i is None:
        block_i = min(512, _round_up(n, 8))
        # Guarantee >= 2 row strips when possible so the "parallel" i axis can
        # actually split across both v7x TensorCores (no-op on v5e/v6e).
        if _round_up(n, block_i) // block_i < 2 and n > 8:
            block_i = max(8, _round_up(pl.cdiv(_round_up(n, 8), 2), 8))
    assert block_i % 8 == 0 and block_j % 128 == 0

    n_i = _round_up(n, block_i)     # padded length of the column (i) view
    n_j = _round_up(n, block_j)     # padded length of the row (j) view
    grid = (n_i // block_i, n_j // block_j)
    ni_blocks = grid[0]

    def _pad(vec, length, value):
        pad = length - n
        if pad == 0:
            return vec
        return jnp.concatenate(
            [vec, jnp.full((pad,), value, dtype=jnp.float32)])

    # Column views padded with +BIG, row views with -BIG => any pair touching
    # a padded index has a hugely negative (-r*y + margin), i.e. residual 0.
    lg_col = _pad(logits, n_i, _BIG).reshape(n_i, 1)
    lb_col = _pad(labels, n_i, _BIG).reshape(n_i, 1)
    lg_row = _pad(logits, n_j, -_BIG).reshape(1, n_j)
    lb_row = _pad(labels, n_j, -_BIG).reshape(1, n_j)

    kernel = functools.partial(_ranking_loss_kernel, margin=float(margin),
                               block_i=block_i, block_j=block_j)

    partials = pl.pallas_call(
        kernel,
        out_shape=jax.ShapeDtypeStruct((ni_blocks * 8, 128), jnp.float32),
        grid_spec=pltpu.PrefetchScalarGridSpec(
            num_scalar_prefetch=0,
            grid=grid,
            in_specs=[
                pl.BlockSpec((block_i, 1), lambda i, j: (i, 0)),   # logits col
                pl.BlockSpec((block_i, 1), lambda i, j: (i, 0)),   # labels col
                pl.BlockSpec((1, block_j), lambda i, j: (0, j)),   # logits row
                pl.BlockSpec((1, block_j), lambda i, j: (0, j)),   # labels row
            ],
            out_specs=pl.BlockSpec((8, 128), lambda i, j: (i, 0)),
            scratch_shapes=[pltpu.VMEM((block_i, 128), jnp.float32)],
        ),
        compiler_params=pltpu.CompilerParams(
            # i strips are independent -> "parallel" (2 TensorCores on v7x);
            # j is the in-strip reduction axis -> "arbitrary".
            dimension_semantics=("parallel", "arbitrary"),
            vmem_limit_bytes=16 * 1024 * 1024,
        ),
        cost_estimate=pl.CostEstimate(
            flops=6 * n_i * n_j,                     # O(N^2) behind O(N) inputs
            transcendentals=0,
            bytes_accessed=4 * (2 * n_i + 2 * n_j + ni_blocks * 8 * 128),
        ),
    )(lg_col, lb_col, lg_row, lb_row)

    # partials holds per-lane/per-sublane sums of all residuals (padding
    # contributes exact zeros); the tiny final reduce is wrapper glue.
    return jnp.sum(partials) / jnp.float32(n * n)


def _ranking_loss_ref(logits, labels, margin=0.0):
    # Pure-JAX reference mirroring the PyTorch semantics.
    y = labels[:, None] - labels[None, :]
    r = jnp.where(logits[:, None] >= logits[None, :], 1.0, -1.0)
    residual = jnp.maximum(-r * y + margin, 0.0)
    return jnp.mean(residual)


if __name__ == "__main__":
    key = jax.random.PRNGKey(0)

    # (n, margin, block_i override, block_j override):
    #  - n=8   : single tile, single strip, lane padding (n_j = 128 > n)
    #  - n=40  : 5 i-strips with block_i=8 (multi-strip accumulation path)
    #  - n=300 : default tile selection -> 2 i-strips, 3 lane chunks per tile
    cases = ((8, 0.0, None, None),
             (40, 0.25, 8, None),
             (300, 0.1, None, None))

    for n, margin, bi, bj in cases:
        key, k1, k2 = jax.random.split(key, 3)
        logits = jax.random.normal(k1, (n,), dtype=jnp.float32)
        labels = jax.random.uniform(k2, (n,), dtype=jnp.float32,
                                    minval=0.0, maxval=5.0)

        loss = ranking_loss(logits, labels, margin, block_i=bi, block_j=bj)
        loss = jax.block_until_ready(loss)

        ref = _ranking_loss_ref(logits, labels, margin)
        assert jnp.allclose(loss, ref, atol=1e-5, rtol=2e-5), (
            n, margin, float(loss), float(ref))

    print("KERNEL_OK")
</pallas_src>

<mosaic_0001>
module attributes {stable_mosaic.version = 11 : i64} {
  func.func @_ranking_loss_kernel(%arg0: i32, %arg1: i32, %arg2: memref<8x1xf32, #tpu.memory_space<vmem>>, %arg3: memref<8x1xf32, #tpu.memory_space<vmem>>, %arg4: memref<1x128xf32, #tpu.memory_space<vmem>>, %arg5: memref<1x128xf32, #tpu.memory_space<vmem>>, %arg6: memref<8x128xf32, #tpu.memory_space<vmem>>, %arg7: memref<8x128xf32, #tpu.memory_space<vmem>>) attributes {dimension_semantics = [#tpu.dimension_semantics<parallel>, #tpu.dimension_semantics<arbitrary>], iteration_bounds = array<i64: 1, 1>, scalar_prefetch = 0 : i64, scratch_operands = 1 : i64, tpu.core_type = #tpu.core_type<tc>, window_params = [{transform_indices = @transform_0, window_bounds = array<i64: 8, 1>}, {transform_indices = @transform_1, window_bounds = array<i64: 8, 1>}, {transform_indices = @transform_2, window_bounds = array<i64: 1, 128>}, {transform_indices = @transform_3, window_bounds = array<i64: 1, 128>}, {transform_indices = @transform_4, window_bounds = array<i64: 8, 128>}]} {
    %c0 = arith.constant 0 : index
    %c0_0 = arith.constant 0 : index
    %0 = vector.load %arg2[%c0, %c0_0] : memref<8x1xf32, #tpu.memory_space<vmem>>, vector<8x1xf32>
    %c0_1 = arith.constant 0 : index
    %c0_2 = arith.constant 0 : index
    %1 = vector.load %arg3[%c0_1, %c0_2] : memref<8x1xf32, #tpu.memory_space<vmem>>, vector<8x1xf32>
    %c0_3 = arith.constant 0 : index
    %c0_4 = arith.constant 0 : index
    %2 = vector.load %arg4[%c0_3, %c0_4] : memref<1x128xf32, #tpu.memory_space<vmem>>, vector<1x128xf32>
    %c0_5 = arith.constant 0 : index
    %c0_6 = arith.constant 0 : index
    %3 = vector.load %arg5[%c0_5, %c0_6] : memref<1x128xf32, #tpu.memory_space<vmem>>, vector<1x128xf32>
    %cst = arith.constant 0.000000e+00 : f32
    %4 = vector.broadcast %cst : f32 to vector<1x128xf32>
    %5 = arith.addf %3, %4 : vector<1x128xf32>
    %cst_7 = arith.constant 0.000000e+00 : f32
    %6 = vector.broadcast %cst_7 : f32 to vector<1x128xf32>
    %7 = arith.subf %3, %6 : vector<1x128xf32>
    %8 = vector.shape_cast %0 : vector<8x1xf32> to vector<8x1xf32>
    %9 = vector.broadcast %8 : vector<8x1xf32> to vector<8x128xf32>
    %10 = vector.shape_cast %1 : vector<8x1xf32> to vector<8x1xf32>
    %11 = vector.broadcast %10 : vector<8x1xf32> to vector<8x128xf32>
    %12 = vector.broadcast %2 : vector<1x128xf32> to vector<8x128xf32>
    %13 = arith.cmpf oge, %9, %12 : vector<8x128xf32>
    %14 = vector.broadcast %5 : vector<1x128xf32> to vector<8x128xf32>
    %15 = arith.subf %14, %11 : vector<8x128xf32>
    %16 = vector.broadcast %7 : vector<1x128xf32> to vector<8x128xf32>
    %17 = arith.subf %11, %16 : vector<8x128xf32>
    %18 = arith.select %13, %15, %17 : vector<8x128xi1>, vector<8x128xf32>
    %cst_8 = arith.constant 0.000000e+00 : f32
    %19 = vector.broadcast %cst_8 : f32 to vector<8x128xf32>
    %20 = arith.maximumf %18, %19 : vector<8x128xf32>
    %c0_i32 = arith.constant 0 : i32
    %21 = arith.cmpi eq, %arg1, %c0_i32 : i32
    %22 = arith.extui %21 : i1 to i32
    %c0_i32_9 = arith.constant 0 : i32
    %23 = arith.cmpi ne, %22, %c0_i32_9 : i32
    scf.if %23 {
      %c0_14 = arith.constant 0 : index
      %c0_15 = arith.constant 0 : index
      %30 = vector.load %arg7[%c0_14, %c0_15] : memref<8x128xf32, #tpu.memory_space<vmem>>, vector<8x128xf32>
      tpu.vector_store %arg7[%c0_14, %c0_15], %20 {strides = array<i32>} : memref<8x128xf32, #tpu.memory_space<vmem>>, vector<8x128xf32>,
    } else {
    }
    %c0_i32_10 = arith.constant 0 : i32
    %24 = arith.cmpi sgt, %arg1, %c0_i32_10 : i32
    %25 = arith.extui %24 : i1 to i32
    %c0_i32_11 = arith.constant 0 : i32
    %26 = arith.cmpi ne, %25, %c0_i32_11 : i32
    scf.if %26 {
      %c0_14 = arith.constant 0 : index
      %c0_15 = arith.constant 0 : index
      %30 = vector.load %arg7[%c0_14, %c0_15] : memref<8x128xf32, #tpu.memory_space<vmem>>, vector<8x128xf32>
      %31 = arith.addf %30, %20 : vector<8x128xf32>
      %c0_16 = arith.constant 0 : index
      %c0_17 = arith.constant 0 : index
      %32 = vector.load %arg7[%c0_16, %c0_17] : memref<8x128xf32, #tpu.memory_space<vmem>>, vector<8x128xf32>
      tpu.vector_store %arg7[%c0_16, %c0_17], %31 {strides = array<i32>} : memref<8x128xf32, #tpu.memory_space<vmem>>, vector<8x128xf32>,
    } else {
    }
    %c0_i32_12 = arith.constant 0 : i32
    %27 = arith.cmpi eq, %arg1, %c0_i32_12 : i32
    %28 = arith.extui %27 : i1 to i32
    %c0_i32_13 = arith.constant 0 : i32
    %29 = arith.cmpi ne, %28, %c0_i32_13 : i32
    scf.if %29 {
      %c0_14 = arith.constant 0 : index
      %c0_15 = arith.constant 0 : index
      %30 = vector.load %arg7[%c0_14, %c0_15] : memref<8x128xf32, #tpu.memory_space<vmem>>, vector<8x128xf32>
      %c0_16 = arith.constant 0 : index
      %c0_17 = arith.constant 0 : index
      %31 = vector.load %arg6[%c0_16, %c0_17] : memref<8x128xf32, #tpu.memory_space<vmem>>, vector<8x128xf32>
      tpu.vector_store %arg6[%c0_16, %c0_17], %30 {strides = array<i32>} : memref<8x128xf32, #tpu.memory_space<vmem>>, vector<8x128xf32>,
    } else {
    }
    return
  }
  func.func @transform_0(%arg0: i32, %arg1: i32) -> (i32, i32) {
    %c0_i32 = arith.constant 0 : i32
    %c0_i32_0 = arith.constant 0 : i32
    return %arg0, %c0_i32 : i32, i32
  }
  func.func @transform_1(%arg0: i32, %arg1: i32) -> (i32, i32) {
    %c0_i32 = arith.constant 0 : i32
    %c0_i32_0 = arith.constant 0 : i32
    return %arg0, %c0_i32 : i32, i32
  }
  func.func @transform_2(%arg0: i32, %arg1: i32) -> (i32, i32) {
    %c0_i32 = arith.constant 0 : i32
    %c0_i32_0 = arith.constant 0 : i32
    return %c0_i32, %arg1 : i32, i32
  }
  func.func @transform_3(%arg0: i32, %arg1: i32) -> (i32, i32) {
    %c0_i32 = arith.constant 0 : i32
    %c0_i32_0 = arith.constant 0 : i32
    return %c0_i32, %arg1 : i32, i32
  }
  func.func @transform_4(%arg0: i32, %arg1: i32) -> (i32, i32) {
    %c0_i32 = arith.constant 0 : i32
    %c0_i32_0 = arith.constant 0 : i32
    return %arg0, %c0_i32 : i32, i32
  }
}

</mosaic_0001>

<bundles_post_ra>
// kernel: tpu_custom_call.1
= control target key start
LH: loop header
LB: loop body
LE: loop exit
PB: predicated region body
PF: predicated region fallthrough
CT: control target
= control target key end

     0   :  { %v116_v1 = vmov 0   ;;  %s167_s0 = inlined_call_operand.vmem [shape: f32[8,1], index: 0, kind: input, shape index: {}]   ;;  %s168_s1 = inlined_call_operand.vmem [shape: f32[8,1], index: 1, kind: input, shape index: {}]   ;;  %s169_s2 = inlined_call_operand.vmem [shape: f32[1,128], index: 2, kind: input, shape index: {}]   ;;  %s170_s3 = inlined_call_operand.vmem [shape: f32[1,128], index: 3, kind: input, shape index: {}]   ;;  %s171_s4 = inlined_call_operand.hbm [shape: f32[8,128], index: 4, kind: output, shape index: {}]  }
   0x1   :  { %v19_v0 = vld [vmem:[%s168_s1] sm:$0xff]  ;;  %91 = vset.pattern.permute.xlu0 %v116_v1 }
   0x2   :  { %9 = vsyncpa [#allocation4], 0  ;;  %30 = vperm.xlu0 %91, %v19_v0   ;;  %v18_v2 = vld [vmem:[%s167_s0] sm:$0xff]  ;;  %s117_s1 = smov [#allocation3]  }
   0x3   :  { %v88_v4 = vld [vmem:[%s170_s3] ss:$0 sm:$0xff]  ;;  %s79_s23 = sshll.u32 %s117_s1, 4  ;;  %s80_s23 = int_to_ptr.vmem [resolvable:$true] %s79_s23 }
   0x4   :  { %v87_v5 = vld [vmem:[%s169_s2] ss:$0 sm:$0xff]  ;;  %s92_s0 = scalar_lea.vmem %s80_s23, 128  ;;  %p97_p1 = scmp.lt.s32.totalorder %s80_s23, %s80_s23 }
   0x5   :  { %p93_p0 = scmp.ne.s32.totalorder %s80_s23, %s92_s0  ;;  %p98_p2 = scmp.lt.s32.totalorder %s92_s0, %s92_s0 }
   0x6   :  { %25 = vperm.xlu0 %91, %v18_v2  }
   0x7   :  { %p99_p3 = por %p98_p2, %p97_p1 }
   0x9   :  { %p100_p4 = pnand %p99_p3, %p93_p0 }
  0x81   :  { %v31_v3 = vpop.permute.xlu0 %30 }
  0x82   :  { %v46_v6 = vsub.f32 %v88_v4, %v31_v3  ;;  %v53_v7 = vsub.f32 %v31_v3, %v88_v4 }
  0x85   :  { %v26_v8 = vpop.permute.xlu0 %25 }
  0x86   :  { %vm39_vm0 = vcmp.ge.f32.partialorder %v26_v8, %v87_v5 }
  0x87   :  { %v54_v9 = vsel %vm39_vm0, %v46_v6, %v53_v7 }
  0x88   :  { %v55_v10 = vmax.f32 %v54_v9, 0.0 }
  0x8a   :  { %72 = vst [vmem:[#allocation3] sm:$0xff] %v55_v10 }
  0x8b   :  { %103 = shalt.err (!%p100_p4)
}
  0x8c   :  { %s104_s2 = scalar_lea.hbm %s171_s4, 128 }
  0x8d   :  { %p105_p5 = scmp.ne.s32.totalorder %s171_s4, %s104_s2  ;;  %p108_p6 = scmp.lt.u32.totalorder %s104_s2, %s171_s4 }
  0x8f   :  { %p110_p7 = pnand %p108_p6, %p105_p5 }
  0x91   :  { %113 = shalt.err (!%p110_p7)
}
  0x92   :  { %82 = dma.vmem_to_hbm [thread:$0]  %s80_s23, 128, %s171_s4, [#allocation4]  }
  0x93   :  { %114 = dma.done.wait [#allocation4], 128  }
  0x94   :  { %115 = vsyncadd [#allocation4], 4294967168 }
  0x95   :  { %86 = vsyncpa [#allocation4], 1 }

</bundles_post_ra>
